<compile_context>
chip_gen: v5e
topology: v5e:2x2
jax: 0.10.0
libtpu: 0.0.40
codegen_flags: <defaults>
</compile_context>

<pallas_src>
import functools
import math

import jax
import jax.numpy as jnp
from jax.experimental import pallas as pl
from jax.experimental.pallas import tpu as pltpu


# -----------------------------------------------------------------------------
# Positional-encoding table (identical to the PyTorch PositionalEncoding init).
# -----------------------------------------------------------------------------
def build_pe(d_model: int, max_len: int = 5000) -> jnp.ndarray:
    position = jnp.arange(max_len, dtype=jnp.float32)[:, None]
    div_term = jnp.exp(jnp.arange(0, d_model, 2, dtype=jnp.float32)
                       * (-math.log(10000.0) / d_model))
    angles = position * div_term
    pe = jnp.zeros((max_len, d_model), dtype=jnp.float32)
    pe = pe.at[:, 0::2].set(jnp.sin(angles))
    pe = pe.at[:, 1::2].set(jnp.cos(angles))
    return pe


# -----------------------------------------------------------------------------
# Tiling helper: largest aligned tile that exactly divides `dim`, else full dim.
# Full-extent blocks are always layout-legal; divisor tiles avoid ragged tails.
# -----------------------------------------------------------------------------
def _pick_tile(dim: int, target: int, align: int) -> int:
    if dim <= target:
        return dim
    t = (target // align) * align
    while t >= align:
        if dim % t == 0:
            return t
        t -= align
    return dim


# -----------------------------------------------------------------------------
# Kernel 1: fused initial projection  ->  SiLU(x @ W + b) + pe_row
# -----------------------------------------------------------------------------
def _linear_silu_pe_kernel(x_ref, w_ref, b_ref, pe_ref, o_ref, acc_ref):
    @pl.when(pl.program_id(2) == 0)
    def _():
        acc_ref[...] = jnp.zeros_like(acc_ref)

    acc_ref[...] += jnp.dot(x_ref[...], w_ref[...],
                            preferred_element_type=jnp.float32)

    @pl.when(pl.program_id(2) == pl.num_programs(2) - 1)
    def _():
        z = acc_ref[...] + b_ref[...]
        silu = z * (1.0 / (1.0 + jnp.exp(-z)))          # SiLU = z * sigmoid(z)
        o_ref[...] = (silu + pe_ref[...]).astype(o_ref.dtype)


def linear_silu_pe_pallas(x, w, b, pe_row, *, tm=256, tn=256, tk=512):
    M, K = x.shape
    Kw, N = w.shape
    assert K == Kw and b.shape[-1] == N and pe_row.shape[-1] == N
    bm = _pick_tile(M, tm, 8)
    bn = _pick_tile(N, tn, 128)
    bk = _pick_tile(K, tk, 128)
    grid = (M // bm, N // bn, K // bk)
    return pl.pallas_call(
        _linear_silu_pe_kernel,
        out_shape=jax.ShapeDtypeStruct((M, N), x.dtype),
        grid_spec=pltpu.PrefetchScalarGridSpec(
            num_scalar_prefetch=0,
            grid=grid,
            in_specs=[
                pl.BlockSpec((bm, bk), lambda i, j, k: (i, k)),   # x
                pl.BlockSpec((bk, bn), lambda i, j, k: (k, j)),   # W
                pl.BlockSpec((1, bn),  lambda i, j, k: (0, j)),   # bias
                pl.BlockSpec((1, bn),  lambda i, j, k: (0, j)),   # pe row
            ],
            out_specs=pl.BlockSpec((bm, bn), lambda i, j, k: (i, j)),
            scratch_shapes=[pltpu.VMEM((bm, bn), jnp.float32)],
        ),
        compiler_params=pltpu.CompilerParams(
            dimension_semantics=("parallel", "parallel", "arbitrary")),
    )(x, w,
      jnp.reshape(b, (1, N)).astype(jnp.float32),
      jnp.reshape(pe_row, (1, N)).astype(jnp.float32))


# -----------------------------------------------------------------------------
# Kernel 2: fused output head  ->  LayerNorm(h @ W + b) * gamma + beta
# -----------------------------------------------------------------------------
def _linear_layernorm_kernel(h_ref, w_ref, b_ref, g_ref, beta_ref, o_ref,
                             acc_ref, *, eps):
    @pl.when(pl.program_id(1) == 0)
    def _():
        acc_ref[...] = jnp.zeros_like(acc_ref)

    acc_ref[...] += jnp.dot(h_ref[...], w_ref[...],
                            preferred_element_type=jnp.float32)

    @pl.when(pl.program_id(1) == pl.num_programs(1) - 1)
    def _():
        z = acc_ref[...] + b_ref[...]
        mu = jnp.mean(z, axis=-1, keepdims=True)
        var = jnp.mean((z - mu) * (z - mu), axis=-1, keepdims=True)
        zn = (z - mu) * jax.lax.rsqrt(var + eps)
        o_ref[...] = (zn * g_ref[...] + beta_ref[...]).astype(o_ref.dtype)


def linear_layernorm_pallas(h, w, b, gamma, beta, *, eps=1e-5, tm=256, tk=512):
    M, K = h.shape
    Kw, N = w.shape
    assert K == Kw
    bm = _pick_tile(M, tm, 8)
    bk = _pick_tile(K, tk, 128)
    grid = (M // bm, K // bk)
    kern = functools.partial(_linear_layernorm_kernel, eps=eps)
    return pl.pallas_call(
        kern,
        out_shape=jax.ShapeDtypeStruct((M, N), h.dtype),
        grid_spec=pltpu.PrefetchScalarGridSpec(
            num_scalar_prefetch=0,
            grid=grid,
            in_specs=[
                pl.BlockSpec((bm, bk), lambda i, k: (i, k)),      # h
                pl.BlockSpec((bk, N),  lambda i, k: (k, 0)),      # W
                pl.BlockSpec((1, N),   lambda i, k: (0, 0)),      # bias
                pl.BlockSpec((1, N),   lambda i, k: (0, 0)),      # gamma
                pl.BlockSpec((1, N),   lambda i, k: (0, 0)),      # beta
            ],
            out_specs=pl.BlockSpec((bm, N), lambda i, k: (i, 0)),
            scratch_shapes=[pltpu.VMEM((bm, N), jnp.float32)],
        ),
        compiler_params=pltpu.CompilerParams(
            dimension_semantics=("parallel", "arbitrary")),
    )(h, w,
      jnp.reshape(b, (1, N)).astype(jnp.float32),
      jnp.reshape(gamma, (1, N)).astype(jnp.float32),
      jnp.reshape(beta, (1, N)).astype(jnp.float32))


# -----------------------------------------------------------------------------
# Transformer encoder stack (plain JAX / XLA), PyTorch semantics in eval mode.
# -----------------------------------------------------------------------------
def _layer_norm(x, gamma, beta, eps=1e-5):
    mu = jnp.mean(x, axis=-1, keepdims=True)
    var = jnp.mean((x - mu) ** 2, axis=-1, keepdims=True)
    return (x - mu) * jax.lax.rsqrt(var + eps) * gamma + beta


def _mha(x, p, num_heads):
    B, S, D = x.shape
    hd = D // num_heads

    def split(t):
        return t.reshape(B, S, num_heads, hd).transpose(0, 2, 1, 3)

    q = split(x @ p["wq"] + p["bq"])
    k = split(x @ p["wk"] + p["bk"])
    v = split(x @ p["wv"] + p["bv"])
    logits = jnp.einsum("bhqd,bhkd->bhqk", q, k) / float(math.sqrt(hd))
    attn = jax.nn.softmax(logits, axis=-1)
    o = jnp.einsum("bhqk,bhkd->bhqd", attn, v)
    o = o.transpose(0, 2, 1, 3).reshape(B, S, D)
    return o @ p["wo"] + p["bo"]


def _transformer_encoder_layer(x, p, num_heads):
    # nn.TransformerEncoderLayer: batch_first=True, norm_first=False,
    # activation=relu, dropout disabled (eval-mode identity).
    x = _layer_norm(x + _mha(x, p["attn"], num_heads), p["ln1_g"], p["ln1_b"])
    ff = jnp.maximum(x @ p["w1"] + p["b1"], 0.0) @ p["w2"] + p["b2"]
    x = _layer_norm(x + ff, p["ln2_g"], p["ln2_b"])
    return x


# -----------------------------------------------------------------------------
# Full SpectroscopyEncoder forward (use_attention=True).
# -----------------------------------------------------------------------------
def spectroscopy_encoder_forward_pallas(params, x, *, num_heads=8):
    if x.ndim == 1:
        x = x[None, :]
    # Fused Pallas kernel: initial_projection (Linear+SiLU) + PE add.
    # seq_len is always 1 here, so PositionalEncoding adds pe[0, :].
    h = linear_silu_pe_pallas(x, params["w_in"], params["b_in"], params["pe"][0])
    h = h[:, None, :]                                   # [B, 1, hidden]
    # TODO(synk): transformer encoder stack stays in plain JAX/XLA.
    for lp in params["layers"]:
        h = _transformer_encoder_layer(h, lp, num_heads)
    h = jnp.mean(h, axis=1)                             # [B, hidden]
    # Fused Pallas kernel: output projection (Linear) + LayerNorm.
    return linear_layernorm_pallas(h, params["w_out"], params["b_out"],
                                   params["ln_g"], params["ln_b"])


def spectroscopy_encoder_forward_ref(params, x, *, num_heads=8):
    if x.ndim == 1:
        x = x[None, :]
    z = x @ params["w_in"] + params["b_in"]
    h = z * jax.nn.sigmoid(z)                           # SiLU
    h = h[:, None, :]
    h = h + params["pe"][: h.shape[1]][None, :, :]      # PositionalEncoding
    for lp in params["layers"]:
        h = _transformer_encoder_layer(h, lp, num_heads)
    h = jnp.mean(h, axis=1)
    z = h @ params["w_out"] + params["b_out"]
    return _layer_norm(z, params["ln_g"], params["ln_b"])


def init_params(key, input_dim, hidden_dim, output_dim, num_layers):
    def dense(k, fan_in, fan_out):
        kw, kb = jax.random.split(k)
        w = jax.random.normal(kw, (fan_in, fan_out), jnp.float32) * 0.02
        b = jax.random.normal(kb, (fan_out,), jnp.float32) * 0.02
        return w, b

    keys = jax.random.split(key, num_layers + 2)
    w_in, b_in = dense(keys[0], input_dim, hidden_dim)
    w_out, b_out = dense(keys[1], hidden_dim, output_dim)
    layers = []
    for li in range(num_layers):
        lk = jax.random.split(keys[2 + li] if num_layers > li else keys[-1], 6)
        wq, bq = dense(lk[0], hidden_dim, hidden_dim)
        wk, bk = dense(lk[1], hidden_dim, hidden_dim)
        wv, bv = dense(lk[2], hidden_dim, hidden_dim)
        wo, bo = dense(lk[3], hidden_dim, hidden_dim)
        w1, b1 = dense(lk[4], hidden_dim, hidden_dim * 4)
        w2, b2 = dense(lk[5], hidden_dim * 4, hidden_dim)
        layers.append({
            "attn": {"wq": wq, "bq": bq, "wk": wk, "bk": bk,
                     "wv": wv, "bv": bv, "wo": wo, "bo": bo},
            "ln1_g": jnp.ones((hidden_dim,), jnp.float32),
            "ln1_b": jnp.zeros((hidden_dim,), jnp.float32),
            "w1": w1, "b1": b1, "w2": w2, "b2": b2,
            "ln2_g": jnp.ones((hidden_dim,), jnp.float32),
            "ln2_b": jnp.zeros((hidden_dim,), jnp.float32),
        })
    pe = build_pe(hidden_dim, max_len=input_dim)        # PositionalEncoding(hidden, max_len=input_dim)
    return {
        "w_in": w_in, "b_in": b_in, "pe": pe, "layers": layers,
        "w_out": w_out, "b_out": b_out,
        "ln_g": jnp.ones((output_dim,), jnp.float32),
        "ln_b": jnp.zeros((output_dim,), jnp.float32),
    }


if __name__ == "__main__":
    key = jax.random.PRNGKey(0)
    B, input_dim, hidden_dim, output_dim = 2, 64, 32, 64
    num_layers, num_heads = 2, 8

    key, pk, xk = jax.random.split(key, 3)
    params = init_params(pk, input_dim, hidden_dim, output_dim, num_layers)
    x = jax.random.normal(xk, (B, input_dim), dtype=jnp.float32)

    # --- Test 1: full SpectroscopyEncoder forward (Pallas fused kernels vs jnp ref). ---
    out = spectroscopy_encoder_forward_pallas(params, x, num_heads=num_heads)
    jax.block_until_ready(out)
    ref = spectroscopy_encoder_forward_ref(params, x, num_heads=num_heads)
    assert out.shape == (B, output_dim)
    assert jnp.allclose(out, ref, atol=2e-2, rtol=2e-2), "forward mismatch vs reference"

    # --- Test 2: fused Linear+SiLU+PE kernel on a multi-tile (M, N, K) grid. ---
    k1, k2, k3 = jax.random.split(jax.random.PRNGKey(1), 3)
    M2, K2, N2 = 16, 256, 256
    x2 = jax.random.normal(k1, (M2, K2), jnp.float32)
    w2 = jax.random.normal(k2, (K2, N2), jnp.float32) * 0.05
    b2 = jax.random.normal(k3, (N2,), jnp.float32) * 0.05
    pe2 = build_pe(N2, 4)[0]
    out2 = linear_silu_pe_pallas(x2, w2, b2, pe2, tm=8, tn=128, tk=128)
    jax.block_until_ready(out2)
    z2 = x2 @ w2 + b2
    ref2 = z2 * jax.nn.sigmoid(z2) + pe2[None, :]
    assert jnp.allclose(out2, ref2, atol=2e-2, rtol=2e-2), "linear+silu+pe mismatch"

    # --- Test 3: fused Linear+LayerNorm kernel on a multi-K-tile grid. ---
    k5, k6, k7 = jax.random.split(jax.random.PRNGKey(2), 3)
    M3, K3, N3 = 16, 256, 128
    h3 = jax.random.normal(k5, (M3, K3), jnp.float32)
    w3 = jax.random.normal(k6, (K3, N3), jnp.float32) * 0.05
    b3 = jax.random.normal(k7, (N3,), jnp.float32) * 0.05
    g3 = jnp.ones((N3,), jnp.float32)
    be3 = jnp.zeros((N3,), jnp.float32)
    out3 = linear_layernorm_pallas(h3, w3, b3, g3, be3, tm=8, tk=128)
    jax.block_until_ready(out3)
    ref3 = _layer_norm(h3 @ w3 + b3, g3, be3)
    assert jnp.allclose(out3, ref3, atol=2e-2, rtol=2e-2), "linear+layernorm mismatch"

    print("KERNEL_OK")
</pallas_src>

<mosaic_0001>
module attributes {stable_mosaic.version = 11 : i64} {
  func.func @_linear_silu_pe_kernel(%arg0: i32, %arg1: i32, %arg2: i32, %arg3: memref<2x64xf32, #tpu.memory_space<vmem>>, %arg4: memref<64x32xf32, #tpu.memory_space<vmem>>, %arg5: memref<1x32xf32, #tpu.memory_space<vmem>>, %arg6: memref<1x32xf32, #tpu.memory_space<vmem>>, %arg7: memref<2x32xf32, #tpu.memory_space<vmem>>, %arg8: memref<2x32xf32, #tpu.memory_space<vmem>>) attributes {dimension_semantics = [#tpu.dimension_semantics<parallel>, #tpu.dimension_semantics<parallel>, #tpu.dimension_semantics<arbitrary>], iteration_bounds = array<i64: 1, 1, 1>, scalar_prefetch = 0 : i64, scratch_operands = 1 : i64, tpu.core_type = #tpu.core_type<tc>, window_params = [{transform_indices = @transform_0, window_bounds = array<i64: 2, 64>}, {transform_indices = @transform_1, window_bounds = array<i64: 64, 32>}, {transform_indices = @transform_2, window_bounds = array<i64: 1, 32>}, {transform_indices = @transform_3, window_bounds = array<i64: 1, 32>}, {transform_indices = @transform_4, window_bounds = array<i64: 2, 32>}]} {
    %c0_i32 = arith.constant 0 : i32
    %0 = arith.cmpi eq, %arg2, %c0_i32 : i32
    %1 = arith.extui %0 : i1 to i32
    %c0_i32_0 = arith.constant 0 : i32
    %2 = arith.cmpi ne, %1, %c0_i32_0 : i32
    scf.if %2 {
      %cst_10 = arith.constant 0.000000e+00 : f32
      %12 = vector.broadcast %cst_10 : f32 to vector<2x32xf32>
      %c0_11 = arith.constant 0 : index
      %c0_12 = arith.constant 0 : index
      %13 = vector.load %arg8[%c0_11, %c0_12] : memref<2x32xf32, #tpu.memory_space<vmem>>, vector<2x32xf32>
      tpu.vector_store %arg8[%c0_11, %c0_12], %12 {strides = array<i32>} : memref<2x32xf32, #tpu.memory_space<vmem>>, vector<2x32xf32>,
    } else {
    }
    %c0 = arith.constant 0 : index
    %c0_1 = arith.constant 0 : index
    %3 = vector.load %arg8[%c0, %c0_1] : memref<2x32xf32, #tpu.memory_space<vmem>>, vector<2x32xf32>
    %c0_2 = arith.constant 0 : index
    %c0_3 = arith.constant 0 : index
    %4 = vector.load %arg3[%c0_2, %c0_3] : memref<2x64xf32, #tpu.memory_space<vmem>>, vector<2x64xf32>
    %c0_4 = arith.constant 0 : index
    %c0_5 = arith.constant 0 : index
    %5 = vector.load %arg4[%c0_4, %c0_5] : memref<64x32xf32, #tpu.memory_space<vmem>>, vector<64x32xf32>
    %cst = arith.constant dense<0.000000e+00> : vector<2x32xf32>
    %6 = tpu.matmul %4, %5, %cst {dimension_numbers = #tpu.dot_dimension_numbers<[1], [0], [0], [1], [0, 0, 1, 1], [], []>} : vector<2x64xf32>, vector<64x32xf32>, vector<2x32xf32> -> vector<2x32xf32>
    %7 = arith.addf %3, %6 : vector<2x32xf32>
    %c0_6 = arith.constant 0 : index
    %c0_7 = arith.constant 0 : index
    %8 = vector.load %arg8[%c0_6, %c0_7] : memref<2x32xf32, #tpu.memory_space<vmem>>, vector<2x32xf32>
    tpu.vector_store %arg8[%c0_6, %c0_7], %7 {strides = array<i32>} : memref<2x32xf32, #tpu.memory_space<vmem>>, vector<2x32xf32>,
    %c0_i32_8 = arith.constant 0 : i32
    %9 = arith.cmpi eq, %arg2, %c0_i32_8 : i32
    %10 = arith.extui %9 : i1 to i32
    %c0_i32_9 = arith.constant 0 : i32
    %11 = arith.cmpi ne, %10, %c0_i32_9 : i32
    scf.if %11 {
      %c0_10 = arith.constant 0 : index
      %c0_11 = arith.constant 0 : index
      %12 = vector.load %arg8[%c0_10, %c0_11] : memref<2x32xf32, #tpu.memory_space<vmem>>, vector<2x32xf32>
      %c0_12 = arith.constant 0 : index
      %c0_13 = arith.constant 0 : index
      %13 = vector.load %arg5[%c0_12, %c0_13] : memref<1x32xf32, #tpu.memory_space<vmem>>, vector<1x32xf32>
      %14 = vector.broadcast %13 : vector<1x32xf32> to vector<2x32xf32>
      %15 = arith.addf %12, %14 : vector<2x32xf32>
      %cst_14 = arith.constant 0.000000e+00 : f32
      %16 = vector.broadcast %cst_14 : f32 to vector<2x32xf32>
      %17 = arith.subf %16, %15 : vector<2x32xf32>
      %18 = math.exp %17 : vector<2x32xf32>
      %cst_15 = arith.constant 1.000000e+00 : f32
      %19 = vector.broadcast %cst_15 : f32 to vector<2x32xf32>
      %20 = arith.addf %19, %18 : vector<2x32xf32>
      %cst_16 = arith.constant 1.000000e+00 : f32
      %21 = vector.broadcast %cst_16 : f32 to vector<2x32xf32>
      %22 = arith.divf %21, %20 : vector<2x32xf32>
      %23 = arith.mulf %15, %22 : vector<2x32xf32>
      %c0_17 = arith.constant 0 : index
      %c0_18 = arith.constant 0 : index
      %24 = vector.load %arg6[%c0_17, %c0_18] : memref<1x32xf32, #tpu.memory_space<vmem>>, vector<1x32xf32>
      %25 = vector.broadcast %24 : vector<1x32xf32> to vector<2x32xf32>
      %26 = arith.addf %23, %25 : vector<2x32xf32>
      %c0_19 = arith.constant 0 : index
      %c0_20 = arith.constant 0 : index
      %27 = vector.load %arg7[%c0_19, %c0_20] : memref<2x32xf32, #tpu.memory_space<vmem>>, vector<2x32xf32>
      tpu.vector_store %arg7[%c0_19, %c0_20], %26 {strides = array<i32>} : memref<2x32xf32, #tpu.memory_space<vmem>>, vector<2x32xf32>,
    } else {
    }
    return
  }
  func.func @transform_0(%arg0: i32, %arg1: i32, %arg2: i32) -> (i32, i32) {
    %c0_i32 = arith.constant 0 : i32
    return %arg0, %arg2 : i32, i32
  }
  func.func @transform_1(%arg0: i32, %arg1: i32, %arg2: i32) -> (i32, i32) {
    %c0_i32 = arith.constant 0 : i32
    return %arg2, %arg1 : i32, i32
  }
  func.func @transform_2(%arg0: i32, %arg1: i32, %arg2: i32) -> (i32, i32) {
    %c0_i32 = arith.constant 0 : i32
    %c0_i32_0 = arith.constant 0 : i32
    return %c0_i32, %arg1 : i32, i32
  }
  func.func @transform_3(%arg0: i32, %arg1: i32, %arg2: i32) -> (i32, i32) {
    %c0_i32 = arith.constant 0 : i32
    %c0_i32_0 = arith.constant 0 : i32
    return %c0_i32, %arg1 : i32, i32
  }
  func.func @transform_4(%arg0: i32, %arg1: i32, %arg2: i32) -> (i32, i32) {
    %c0_i32 = arith.constant 0 : i32
    return %arg0, %arg1 : i32, i32
  }
}

</mosaic_0001>

<bundles_post_ra>
// kernel: tpu_custom_call.1
= control target key start
LH: loop header
LB: loop body
LE: loop exit
PB: predicated region body
PF: predicated region fallthrough
CT: control target
= control target key end

     0   :  { %vm22_vm0 = vcmask 254976   ;;  %v147_v2 = vmov 0.0   ;;  %s213_s0 = inlined_call_operand.vmem [shape: f32[2,64], index: 0, kind: input, shape index: {}]   ;;  %s214_s1 = inlined_call_operand.vmem [shape: f32[64,32], index: 1, kind: input, shape index: {}]   ;;  %s215_s2 = inlined_call_operand.vmem [shape: f32[1,32], index: 2, kind: input, shape index: {}]   ;;  %s216_s3 = inlined_call_operand.vmem [shape: f32[1,32], index: 3, kind: input, shape index: {}]   ;;  %s217_s4 = inlined_call_operand.hbm [shape: f32[2,32], index: 4, kind: output, shape index: {}]  }
   0x1   :  { %v33_v0 = vld [vmem:[%s214_s1 + $0x38] sm:$0xff]  ;;  %v32_v1 = vld [vmem:[%s214_s1 + $0x30] sm:$0xff]  ;;  %23 = vst.msk [vmem:[#allocation2] sm:$0x3] %vm22_vm0, %v147_v2  ;;  %v31_v3 = vld [vmem:[%s214_s1 + $0x28] sm:$0xff] }
   0x2   :  { %46 = vmatpush.msra.mxu0 %v33_v0 }
   0x4   :  { %47 = vmatpush.msra.mxu0 %v32_v1 }
   0x5   :  { %9 = vsyncpa [#allocation4], 0  ;;  %v30_v4 = vld [vmem:[%s214_s1 + $0x20] sm:$0xff]  ;;  %v29_v5 = vld [vmem:[%s214_s1 + $0x18] sm:$0xff]  ;;  %vm34_vm1 = vcmask 523264   ;;  %s103_s12 = sshll.u32 %s217_s4, 4  ;;  %s104_s12 = int_to_ptr.hbm [resolvable:$true] %s103_s12 }
   0x6   :  { %48 = vmatpush.msra.mxu0 %v31_v3  ;;  %v28_v6 = vld [vmem:[%s214_s1 + $0x10] sm:$0xff]  ;;  %v27_v7 = vld [vmem:[%s214_s1 + $0x8] sm:$0xff]  ;;  %v26_v8 = vld [vmem:[%s214_s1] sm:$0xff] }
   0x7   :  { %v25_v9 = vld [vmem:[%s213_s0] sm:$0x3] }
   0x8   :  { %49 = vmatpush.msra.mxu0 %v30_v4  ;;  %v24_v10 = vld [vmem:[#allocation2] sm:$0x3] }
   0x9   :  { %v115_v13 = vld [vmem:[%s215_s2] ss:$0 sm:$0xff]  ;;  %s148_s2 = smov [#allocation3]  }
   0xa   :  { %50 = vmatpush.msra.mxu0 %v29_v5  ;;  %v116_v29 = vld [vmem:[%s216_s3] ss:$0 sm:$0xff]  ;;  %s101_s9 = sshll.u32 %s148_s2, 4  ;;  %s102_s9 = int_to_ptr.vmem [resolvable:$true] %s101_s9 }
   0xc   :  { %51 = vmatpush.msra.mxu0 %v28_v6 }
   0xe   :  { %52 = vmatpush.msra.mxu0 %v27_v7 }
  0x10   :  { %53 = vmatpush.msra.mxu0 %v26_v8 }
  0x11   :  { %112 = vmatmul.msk.f32.vlgmr.msra.gmra.mxu0 %vm34_vm1, %v25_v9 }
  0x8e   :  { %v55_v11 = vpop.f32.mrf.mxu0 }
  0x8f   :  { %v58_v12 = vadd.f32 %v55_v11, %v24_v10 }
  0x91   :  { %60 = vst.msk [vmem:[#allocation2] sm:$0x3] %vm22_vm0, %v58_v12 }
  0x98   :  { %v64_v14 = vld [vmem:[#allocation2] sm:$0x3] }
  0x99   :  { %v69_v15 = vadd.f32 %v115_v13, %v64_v14 }
  0x9b   :  { %v70_v16 = vsub.f32 0.0, %v69_v15 }
  0x9d   :  { %v71_v17 = vmul.f32 1.442695, %v70_v16 }
  0x9f   :  { %117 = vpow2.f32 %v71_v17 }
  0xa5   :  { %v118_v18 = vpop.eup %117 }
  0xa6   :  { %v73_v19 = vadd.f32 1.0, %v118_v18 }
  0xa8   :  { %119 = vrcp.f32 %v73_v19  ;;  %v85_v23 = vand.u32 2147483648, %v73_v19  ;;  %v83_v25 = vand.u32 2147483647, %v73_v19  ;;  %vm79_vm3 = vweird.f32 %v73_v19 }
  0xaa   :  { %v86_v27 = vor.u32 1.1754944e-38, %v85_v23  ;;  %vm84_vm5 = vcmp.eq.f32.partialorder %v83_v25, 8.507059e+37 }
  0xae   :  { %v120_v20 = vpop.eup %119 }
  0xaf   :  { %v75_v21 = vmul.f32 %v120_v20, %v73_v19  ;;  %vm80_vm2 = vweird.f32 %v120_v20 }
  0xb0   :  { %vm81_vm4 = vmor %vm79_vm3, %vm80_vm2 }
  0xb1   :  { %v76_v22 = vsub.f32 1.0, %v75_v21 }
  0xb3   :  { %v77_v24 = vmul.f32 %v120_v20, %v76_v22 }
  0xb5   :  { %v78_v26 = vadd.f32 %v120_v20, %v77_v24 }
  0xb7   :  { %v82_v28 = vsel %vm81_vm4, %v120_v20, %v78_v26 }
  0xb8   :  { %v87_v30 = vsel %vm84_vm5, %v86_v27, %v82_v28 }
  0xb9   :  { %v89_v31 = vmul.f32 %v87_v30, %v69_v15 }
  0xbb   :  { %v94_v32 = vadd.f32 %v116_v29, %v89_v31 }
  0xbd   :  { %95 = vst.msk [vmem:[#allocation3] sm:$0x3] %vm22_vm0, %v94_v32 }
  0xbe   :  { %106 = dma.vmem_to_hbm [thread:$0]  %s102_s9, 32, %s104_s12, [#allocation4]  }
  0xbf   :  { %145 = dma.done.wait [#allocation4], 32  }
  0xc0   :  { %146 = vsyncadd [#allocation4], 4294967264 }
  0xc1   :  { %111 = vsyncpa [#allocation4], 1 }

</bundles_post_ra>
